<compile_context>
chip_gen: v5e
topology: v5e:2x2
jax: 0.10.0
libtpu: 0.0.40
codegen_flags: <defaults>
</compile_context>

<pallas_src>
import functools
import math

import numpy as np
import jax
import jax.numpy as jnp
from jax import lax
from jax.experimental import pallas as pl
from jax.experimental.pallas import tpu as pltpu


def _pack_tap_weights(w_t, b):
    """Pack a ConvTranspose2d(k=3, s=2, p=1, op=1) weight into per-tap form.

    w_t : (Cin, Cout, 3, 3)  PyTorch ConvTranspose2d weight layout
    b   : (Cout,)

    Returns:
      wtap : (4, 4*Cout, Cin)  wtap[t, p*Cout+co, ci] = w_t[ci, co, kh, kw]
             for tap t=(dy,dx), output phase p=(ry,rx), kh=1+ry-2dy,
             kw=1+rx-2dx; zero where the tap does not contribute to the phase.
      bcol : (4*Cout, 1)       bias replicated once per phase block.
    """
    cin, cout = w_t.shape[0], w_t.shape[1]
    w_np = np.asarray(w_t, np.float32)
    wtap = np.zeros((4, 4 * cout, cin), np.float32)
    for dy in (0, 1):
        for dx in (0, 1):
            t = dy * 2 + dx
            for ry in (0, 1):
                for rx in (0, 1):
                    if (dy == 1 and ry == 0) or (dx == 1 and rx == 0):
                        continue  # this tap never feeds this output phase
                    p = ry * 2 + rx
                    kh = 1 + ry - 2 * dy
                    kw = 1 + rx - 2 * dx
                    wtap[t, p * cout:(p + 1) * cout, :] = w_np[:, :, kh, kw].T
    bcol = np.tile(np.asarray(b, np.float32), 4).reshape(4 * cout, 1)
    return jnp.asarray(wtap), jnp.asarray(bcol)


def _build_shift_mats(b_chunk, h, w):
    """0/1 matrices that shift a (C, b*h*w) plane by +1 in x / y / both.

    Lanes flatten (b, y, x) with x fastest.  Far-edge positions (x==w-1 for the
    x-shift, y==h-1 for the y-shift) are zeroed, which is exactly the
    ConvTranspose far-boundary condition.  Applied as `plane @ S` on the MXU.
    """
    nb = b_chunk * h * w
    sx = np.zeros((nb, nb), np.float32)
    sy = np.zeros((nb, nb), np.float32)
    sxy = np.zeros((nb, nb), np.float32)
    for bb in range(b_chunk):
        for i in range(h):
            for j in range(w):
                m = (bb * h + i) * w + j
                if j + 1 < w:
                    sx[m + 1, m] = 1.0
                if i + 1 < h:
                    sy[m + w, m] = 1.0
                if (j + 1 < w) and (i + 1 < h):
                    sxy[m + w + 1, m] = 1.0
    return jnp.asarray(np.stack([sx, sy, sxy], axis=0))


def _decoder_kernel(x_ref, s_ref, *args, num_layers):
    """Fully fused decoder forward for one batch chunk.

    x_ref   : (1, C0, NB)            NB = b_chunk*H0*W0 lanes, flat (b, y, x)
    s_ref   : (3, NB, NB)            shift-select matrices [x, y, xy]
    args    : (w0, b0, w1, b1, ..., out_ref)
              w_l : (4, 4*Cout_l, Cin_l) per-tap packed weight
              b_l : (4*Cout_l, 1)        phase-tiled bias
    out_ref : (1, 4^(L-1), 4*C_last, NB) phase-plane output (interleaved in
              the wrapper).
    """
    out_ref = args[-1]
    wb = args[:-1]

    s_x = s_ref[0]
    s_y = s_ref[1]
    s_xy = s_ref[2]

    # Phase-separated activation: list of 4^l planes, each (C, NB).
    # Plane index = phi_y * 2^l + phi_x (accumulated sub-pixel phase bits).
    planes = [x_ref[0]]
    lbits = 0

    for layer in range(num_layers):
        w_ref = wb[2 * layer]        # (4, 4*Cout, Cin)
        b_ref = wb[2 * layer + 1]    # (4*Cout, 1)
        cout = w_ref.shape[1] // 4
        bias = b_ref[...]
        n_in = 1 << lbits
        is_last = (layer == num_layers - 1)

        cache = {}

        def shifted_plane(idx, cy, cx, _cache=cache, _planes=planes):
            """Source plane `idx`, shifted by +1 coarse row/col when carrying."""
            key = (idx, cy, cx)
            if key not in _cache:
                p = _planes[idx]
                if cy and cx:
                    v = jnp.dot(p, s_xy, preferred_element_type=jnp.float32)
                elif cy:
                    v = jnp.dot(p, s_y, preferred_element_type=jnp.float32)
                elif cx:
                    v = jnp.dot(p, s_x, preferred_element_type=jnp.float32)
                else:
                    v = p
                _cache[key] = v
            return _cache[key]

        n_out = n_in * 2
        new_planes = [None] * (n_out * n_out)

        for py in range(n_in):
            for px in range(n_in):
                in_idx = py * n_in + px
                acc = None
                for dy in (0, 1):
                    for dx in (0, 1):
                        t = dy * 2 + dx
                        ny = py + dy
                        nx = px + dx
                        cy = ny >> lbits            # phase-bit carry -> +1 row
                        cx = nx >> lbits            # phase-bit carry -> +1 col
                        spy = ny & (n_in - 1)
                        spx = nx & (n_in - 1)
                        src = shifted_plane(spy * n_in + spx, cy, cx)
                        term = jnp.dot(w_ref[t], src,
                                       preferred_element_type=jnp.float32)
                        acc = term if acc is None else acc + term
                z = jnp.maximum(acc + bias, 0.0)     # (4*Cout, NB)

                if is_last:
                    out_ref[0, in_idx, :, :] = z
                else:
                    # Split the 4 output phases into new (aligned) planes.
                    for ry in (0, 1):
                        for rx in (0, 1):
                            pp = ry * 2 + rx
                            blk = z[pp * cout:(pp + 1) * cout, :]
                            oy = (py << 1) | ry
                            ox = (px << 1) | rx
                            new_planes[oy * n_out + ox] = blk

        planes = new_planes
        lbits += 1


def _decoder_forward(xg, s_mats, packed, num_layers):
    g, c0, nb = xg.shape
    p_out = 4 ** (num_layers - 1)
    c_last4 = packed[-1][0].shape[1]

    in_specs = [
        pl.BlockSpec((1, c0, nb), lambda i: (i, 0, 0)),
        pl.BlockSpec(s_mats.shape, lambda i: (0, 0, 0)),
    ]
    inputs = [xg, s_mats]
    for (wtap, bcol) in packed:
        in_specs.append(pl.BlockSpec(wtap.shape, lambda i: (0, 0, 0)))
        in_specs.append(pl.BlockSpec(bcol.shape, lambda i: (0, 0)))
        inputs.append(wtap)
        inputs.append(bcol)

    kernel = functools.partial(_decoder_kernel, num_layers=num_layers)
    return pl.pallas_call(
        kernel,
        out_shape=jax.ShapeDtypeStruct((g, p_out, c_last4, nb), jnp.float32),
        grid_spec=pltpu.PrefetchScalarGridSpec(
            num_scalar_prefetch=0,
            grid=(g,),
            in_specs=in_specs,
            out_specs=pl.BlockSpec((1, p_out, c_last4, nb),
                                   lambda i: (i, 0, 0, 0)),
        ),
        compiler_params=pltpu.CompilerParams(
            dimension_semantics=("parallel",)),
    )(*inputs)


@functools.partial(jax.jit, static_argnums=(3, 4))
def _decoder_apply(x_nchw, s_mats, packed, num_layers, num_steps):
    n, c0, h0, w0 = x_nchw.shape
    bc = n // num_steps
    nb = bc * h0 * w0

    # (N, C, H, W) -> (G, C, bc*H*W); lanes flatten (b_local, y, x). Tiny glue.
    xg = x_nchw.reshape(num_steps, bc, c0, h0, w0)
    xg = jnp.transpose(xg, (0, 2, 1, 3, 4)).reshape(num_steps, c0, nb)

    out = _decoder_forward(xg, s_mats, packed, num_layers)
    # out: (G, 4^(L-1) [= (py,px)], 4*C_last [= (ry,rx,c)], bc*H0*W0)

    c_last = out.shape[2] // 4
    nh = 2 ** (num_layers - 1)
    sc = 2 ** num_layers
    out = out.reshape(num_steps, nh, nh, 2, 2, c_last, bc, h0, w0)
    # dims: (g, py, px, ry, rx, c, b_local, ay, ax);  Y = ay*sc + 2*py + ry
    out = jnp.transpose(out, (0, 6, 5, 7, 1, 3, 8, 2, 4))
    return out.reshape(n, c_last, h0 * sc, w0 * sc)


def _num_grid_steps(batch):
    """One fused step on single-TC chips; split batch over 2 steps on v7x."""
    try:
        kind = jax.devices()[0].device_kind.lower()
    except Exception:
        kind = ""
    if batch % 2 == 0 and ("v7" in kind or "tpu7" in kind):
        return 2
    return 1


class DecoderPallas:
    """JAX/Pallas port of the PyTorch Decoder module (fully fused forward)."""

    def __init__(self, hidden_channel, hidden_dim, decoded_channel, img_dim, key):
        scale_w = img_dim[0] // hidden_dim[2]
        scale_h = img_dim[1] // hidden_dim[1]
        assert scale_w == scale_h
        self.num_deconv = int(math.log(scale_w, 2))
        self.params = []   # raw PyTorch-layout params (for the reference check)
        for layer_idx in range(self.num_deconv):
            c_out = hidden_channel if layer_idx < self.num_deconv - 1 else decoded_channel
            key, wk, bk = jax.random.split(key, 3)
            # nn.ConvTranspose2d weight shape: (C_in, C_out, kH, kW); deterministic init.
            w = 0.1 * jax.random.normal(wk, (hidden_channel, c_out, 3, 3), jnp.float32)
            bb = 0.1 * jax.random.normal(bk, (c_out,), jnp.float32)
            self.params.append((w, bb))
        # Per-tap packed weights, built once at construction time.
        self.packed = tuple(_pack_tap_weights(w, bb) for (w, bb) in self.params)

    def __call__(self, x_nchw):
        if self.num_deconv == 0:
            return x_nchw
        n, _, h, w = x_nchw.shape
        steps = _num_grid_steps(n)
        s_mats = _build_shift_mats(n // steps, h, w)
        return _decoder_apply(x_nchw, s_mats, self.packed, self.num_deconv, steps)


def _ref_forward(x_nchw, params):
    """Pure-JAX reference (transposed conv via lhs_dilation) for verification."""
    x = x_nchw
    for (w_t, bb) in params:
        w_flip = jnp.transpose(w_t[:, :, ::-1, ::-1], (1, 0, 2, 3))  # -> OIHW
        y = lax.conv_general_dilated(
            x, w_flip, window_strides=(1, 1),
            padding=((1, 2), (1, 2)), lhs_dilation=(2, 2),
            dimension_numbers=("NCHW", "OIHW", "NCHW"))
        x = jnp.maximum(y + bb.reshape(1, -1, 1, 1), 0.0)
    return x


if __name__ == "__main__":
    key = jax.random.PRNGKey(0)
    hidden_channel, decoded_channel = 8, 3
    hidden_dim = (hidden_channel, 4, 4)   # (C, H, W) of the latent
    img_dim = (16, 16)                    # (W, H) of the decoded image -> 2 deconv layers

    key, xk, pk = jax.random.split(key, 3)
    x = jax.random.normal(
        xk, (2, hidden_channel, hidden_dim[1], hidden_dim[2]), jnp.float32)

    decoder = DecoderPallas(hidden_channel, hidden_dim, decoded_channel, img_dim, pk)
    out = jax.block_until_ready(decoder(x))

    assert out.shape == (2, decoded_channel, img_dim[1], img_dim[0]), out.shape
    ref = _ref_forward(x, decoder.params)
    if not jnp.allclose(out, ref, atol=5e-4, rtol=5e-4):
        max_err = float(jnp.max(jnp.abs(out - ref)))
        raise AssertionError(
            f"Pallas decoder output mismatch vs JAX reference (max err {max_err})")
    print("KERNEL_OK")
</pallas_src>

<mosaic_0001>
module attributes {stable_mosaic.version = 11 : i64} {
  func.func @_decoder_kernel(%arg0: i32, %arg1: memref<1x8x32xf32, #tpu.memory_space<vmem>>, %arg2: memref<3x32x32xf32, #tpu.memory_space<vmem>>, %arg3: memref<4x32x8xf32, #tpu.memory_space<vmem>>, %arg4: memref<32x1xf32, #tpu.memory_space<vmem>>, %arg5: memref<4x12x8xf32, #tpu.memory_space<vmem>>, %arg6: memref<12x1xf32, #tpu.memory_space<vmem>>, %arg7: memref<1x4x12x32xf32, #tpu.memory_space<vmem>>) attributes {dimension_semantics = [#tpu.dimension_semantics<parallel>], iteration_bounds = array<i64: 1>, scalar_prefetch = 0 : i64, scratch_operands = 0 : i64, tpu.core_type = #tpu.core_type<tc>, window_params = [{transform_indices = @transform_0, window_bounds = array<i64: 1, 8, 32>}, {pipeline_mode = #tpu.pipeline_mode<synchronous>, transform_indices = @transform_1, window_bounds = array<i64: 3, 32, 32>}, {pipeline_mode = #tpu.pipeline_mode<synchronous>, transform_indices = @transform_2, window_bounds = array<i64: 4, 32, 8>}, {pipeline_mode = #tpu.pipeline_mode<synchronous>, transform_indices = @transform_3, window_bounds = array<i64: 32, 1>}, {pipeline_mode = #tpu.pipeline_mode<synchronous>, transform_indices = @transform_4, window_bounds = array<i64: 4, 12, 8>}, {pipeline_mode = #tpu.pipeline_mode<synchronous>, transform_indices = @transform_5, window_bounds = array<i64: 12, 1>}, {transform_indices = @transform_6, window_bounds = array<i64: 1, 4, 12, 32>}]} {
    %c0 = arith.constant 0 : index
    %c0_0 = arith.constant 0 : index
    %c0_1 = arith.constant 0 : index
    %0 = vector.load %arg2[%c0, %c0_0, %c0_1] : memref<3x32x32xf32, #tpu.memory_space<vmem>>, vector<1x32x32xf32>
    %1 = vector.shape_cast %0 : vector<1x32x32xf32> to vector<32x32xf32>
    %c1 = arith.constant 1 : index
    %c0_2 = arith.constant 0 : index
    %c0_3 = arith.constant 0 : index
    %2 = vector.load %arg2[%c1, %c0_2, %c0_3] : memref<3x32x32xf32, #tpu.memory_space<vmem>>, vector<1x32x32xf32>
    %3 = vector.shape_cast %2 : vector<1x32x32xf32> to vector<32x32xf32>
    %c2 = arith.constant 2 : index
    %c0_4 = arith.constant 0 : index
    %c0_5 = arith.constant 0 : index
    %4 = vector.load %arg2[%c2, %c0_4, %c0_5] : memref<3x32x32xf32, #tpu.memory_space<vmem>>, vector<1x32x32xf32>
    %5 = vector.shape_cast %4 : vector<1x32x32xf32> to vector<32x32xf32>
    %c0_6 = arith.constant 0 : index
    %c0_7 = arith.constant 0 : index
    %c0_8 = arith.constant 0 : index
    %6 = vector.load %arg1[%c0_6, %c0_7, %c0_8] : memref<1x8x32xf32, #tpu.memory_space<vmem>>, vector<1x8x32xf32>
    %7 = vector.shape_cast %6 : vector<1x8x32xf32> to vector<8x32xf32>
    %c0_9 = arith.constant 0 : index
    %c0_10 = arith.constant 0 : index
    %8 = vector.load %arg4[%c0_9, %c0_10] : memref<32x1xf32, #tpu.memory_space<vmem>>, vector<32x1xf32>
    %c0_11 = arith.constant 0 : index
    %c0_12 = arith.constant 0 : index
    %c0_13 = arith.constant 0 : index
    %9 = vector.load %arg3[%c0_11, %c0_12, %c0_13] : memref<4x32x8xf32, #tpu.memory_space<vmem>>, vector<1x32x8xf32>
    %10 = vector.shape_cast %9 : vector<1x32x8xf32> to vector<32x8xf32>
    %cst = arith.constant dense<0.000000e+00> : vector<32x32xf32>
    %11 = tpu.matmul %10, %7, %cst {dimension_numbers = #tpu.dot_dimension_numbers<[1], [0], [0], [1], [0, 0, 1, 1], [], []>} : vector<32x8xf32>, vector<8x32xf32>, vector<32x32xf32> -> vector<32x32xf32>
    %cst_14 = arith.constant dense<0.000000e+00> : vector<8x32xf32>
    %12 = tpu.matmul %7, %1, %cst_14 {dimension_numbers = #tpu.dot_dimension_numbers<[1], [0], [0], [1], [0, 0, 1, 1], [], []>} : vector<8x32xf32>, vector<32x32xf32>, vector<8x32xf32> -> vector<8x32xf32>
    %c1_15 = arith.constant 1 : index
    %c0_16 = arith.constant 0 : index
    %c0_17 = arith.constant 0 : index
    %13 = vector.load %arg3[%c1_15, %c0_16, %c0_17] : memref<4x32x8xf32, #tpu.memory_space<vmem>>, vector<1x32x8xf32>
    %14 = vector.shape_cast %13 : vector<1x32x8xf32> to vector<32x8xf32>
    %cst_18 = arith.constant dense<0.000000e+00> : vector<32x32xf32>
    %15 = tpu.matmul %14, %12, %cst_18 {dimension_numbers = #tpu.dot_dimension_numbers<[1], [0], [0], [1], [0, 0, 1, 1], [], []>} : vector<32x8xf32>, vector<8x32xf32>, vector<32x32xf32> -> vector<32x32xf32>
    %16 = arith.addf %11, %15 : vector<32x32xf32>
    %cst_19 = arith.constant dense<0.000000e+00> : vector<8x32xf32>
    %17 = tpu.matmul %7, %3, %cst_19 {dimension_numbers = #tpu.dot_dimension_numbers<[1], [0], [0], [1], [0, 0, 1, 1], [], []>} : vector<8x32xf32>, vector<32x32xf32>, vector<8x32xf32> -> vector<8x32xf32>
    %c2_20 = arith.constant 2 : index
    %c0_21 = arith.constant 0 : index
    %c0_22 = arith.constant 0 : index
    %18 = vector.load %arg3[%c2_20, %c0_21, %c0_22] : memref<4x32x8xf32, #tpu.memory_space<vmem>>, vector<1x32x8xf32>
    %19 = vector.shape_cast %18 : vector<1x32x8xf32> to vector<32x8xf32>
    %cst_23 = arith.constant dense<0.000000e+00> : vector<32x32xf32>
    %20 = tpu.matmul %19, %17, %cst_23 {dimension_numbers = #tpu.dot_dimension_numbers<[1], [0], [0], [1], [0, 0, 1, 1], [], []>} : vector<32x8xf32>, vector<8x32xf32>, vector<32x32xf32> -> vector<32x32xf32>
    %21 = arith.addf %16, %20 : vector<32x32xf32>
    %cst_24 = arith.constant dense<0.000000e+00> : vector<8x32xf32>
    %22 = tpu.matmul %7, %5, %cst_24 {dimension_numbers = #tpu.dot_dimension_numbers<[1], [0], [0], [1], [0, 0, 1, 1], [], []>} : vector<8x32xf32>, vector<32x32xf32>, vector<8x32xf32> -> vector<8x32xf32>
    %c3 = arith.constant 3 : index
    %c0_25 = arith.constant 0 : index
    %c0_26 = arith.constant 0 : index
    %23 = vector.load %arg3[%c3, %c0_25, %c0_26] : memref<4x32x8xf32, #tpu.memory_space<vmem>>, vector<1x32x8xf32>
    %24 = vector.shape_cast %23 : vector<1x32x8xf32> to vector<32x8xf32>
    %cst_27 = arith.constant dense<0.000000e+00> : vector<32x32xf32>
    %25 = tpu.matmul %24, %22, %cst_27 {dimension_numbers = #tpu.dot_dimension_numbers<[1], [0], [0], [1], [0, 0, 1, 1], [], []>} : vector<32x8xf32>, vector<8x32xf32>, vector<32x32xf32> -> vector<32x32xf32>
    %26 = arith.addf %21, %25 : vector<32x32xf32>
    %27 = vector.broadcast %8 : vector<32x1xf32> to vector<32x32xf32>
    %28 = arith.addf %26, %27 : vector<32x32xf32>
    %cst_28 = arith.constant 0.000000e+00 : f32
    %29 = vector.broadcast %cst_28 : f32 to vector<32x32xf32>
    %30 = arith.maximumf %28, %29 : vector<32x32xf32>
    %31 = vector.extract_strided_slice %30 {offsets = [0, 0], sizes = [8, 32], strides = [1, 1]} : vector<32x32xf32> to vector<8x32xf32>
    %32 = vector.extract_strided_slice %30 {offsets = [8, 0], sizes = [8, 32], strides = [1, 1]} : vector<32x32xf32> to vector<8x32xf32>
    %33 = vector.extract_strided_slice %30 {offsets = [16, 0], sizes = [8, 32], strides = [1, 1]} : vector<32x32xf32> to vector<8x32xf32>
    %34 = vector.extract_strided_slice %30 {offsets = [24, 0], sizes = [8, 32], strides = [1, 1]} : vector<32x32xf32> to vector<8x32xf32>
    %c0_29 = arith.constant 0 : index
    %c0_30 = arith.constant 0 : index
    %35 = vector.load %arg6[%c0_29, %c0_30] : memref<12x1xf32, #tpu.memory_space<vmem>>, vector<12x1xf32>
    %c0_31 = arith.constant 0 : index
    %c0_32 = arith.constant 0 : index
    %c0_33 = arith.constant 0 : index
    %36 = vector.load %arg5[%c0_31, %c0_32, %c0_33] : memref<4x12x8xf32, #tpu.memory_space<vmem>>, vector<1x12x8xf32>
    %37 = vector.shape_cast %36 : vector<1x12x8xf32> to vector<12x8xf32>
    %cst_34 = arith.constant dense<0.000000e+00> : vector<12x32xf32>
    %38 = tpu.matmul %37, %31, %cst_34 {dimension_numbers = #tpu.dot_dimension_numbers<[1], [0], [0], [1], [0, 0, 1, 1], [], []>} : vector<12x8xf32>, vector<8x32xf32>, vector<12x32xf32> -> vector<12x32xf32>
    %c1_35 = arith.constant 1 : index
    %c0_36 = arith.constant 0 : index
    %c0_37 = arith.constant 0 : index
    %39 = vector.load %arg5[%c1_35, %c0_36, %c0_37] : memref<4x12x8xf32, #tpu.memory_space<vmem>>, vector<1x12x8xf32>
    %40 = vector.shape_cast %39 : vector<1x12x8xf32> to vector<12x8xf32>
    %cst_38 = arith.constant dense<0.000000e+00> : vector<12x32xf32>
    %41 = tpu.matmul %40, %32, %cst_38 {dimension_numbers = #tpu.dot_dimension_numbers<[1], [0], [0], [1], [0, 0, 1, 1], [], []>} : vector<12x8xf32>, vector<8x32xf32>, vector<12x32xf32> -> vector<12x32xf32>
    %42 = arith.addf %38, %41 : vector<12x32xf32>
    %c2_39 = arith.constant 2 : index
    %c0_40 = arith.constant 0 : index
    %c0_41 = arith.constant 0 : index
    %43 = vector.load %arg5[%c2_39, %c0_40, %c0_41] : memref<4x12x8xf32, #tpu.memory_space<vmem>>, vector<1x12x8xf32>
    %44 = vector.shape_cast %43 : vector<1x12x8xf32> to vector<12x8xf32>
    %cst_42 = arith.constant dense<0.000000e+00> : vector<12x32xf32>
    %45 = tpu.matmul %44, %33, %cst_42 {dimension_numbers = #tpu.dot_dimension_numbers<[1], [0], [0], [1], [0, 0, 1, 1], [], []>} : vector<12x8xf32>, vector<8x32xf32>, vector<12x32xf32> -> vector<12x32xf32>
    %46 = arith.addf %42, %45 : vector<12x32xf32>
    %c3_43 = arith.constant 3 : index
    %c0_44 = arith.constant 0 : index
    %c0_45 = arith.constant 0 : index
    %47 = vector.load %arg5[%c3_43, %c0_44, %c0_45] : memref<4x12x8xf32, #tpu.memory_space<vmem>>, vector<1x12x8xf32>
    %48 = vector.shape_cast %47 : vector<1x12x8xf32> to vector<12x8xf32>
    %cst_46 = arith.constant dense<0.000000e+00> : vector<12x32xf32>
    %49 = tpu.matmul %48, %34, %cst_46 {dimension_numbers = #tpu.dot_dimension_numbers<[1], [0], [0], [1], [0, 0, 1, 1], [], []>} : vector<12x8xf32>, vector<8x32xf32>, vector<12x32xf32> -> vector<12x32xf32>
    %50 = arith.addf %46, %49 : vector<12x32xf32>
    %51 = vector.broadcast %35 : vector<12x1xf32> to vector<12x32xf32>
    %52 = arith.addf %50, %51 : vector<12x32xf32>
    %cst_47 = arith.constant 0.000000e+00 : f32
    %53 = vector.broadcast %cst_47 : f32 to vector<12x32xf32>
    %54 = arith.maximumf %52, %53 : vector<12x32xf32>
    %c0_48 = arith.constant 0 : index
    %c0_49 = arith.constant 0 : index
    %c0_50 = arith.constant 0 : index
    %c0_51 = arith.constant 0 : index
    %55 = vector.load %arg7[%c0_48, %c0_49, %c0_50, %c0_51] : memref<1x4x12x32xf32, #tpu.memory_space<vmem>>, vector<1x1x12x32xf32>
    %56 = vector.shape_cast %55 : vector<1x1x12x32xf32> to vector<12x32xf32>
    %57 = vector.shape_cast %54 : vector<12x32xf32> to vector<1x1x12x32xf32>
    tpu.vector_store %arg7[%c0_48, %c0_49, %c0_50, %c0_51], %57 {strides = array<i32>} : memref<1x4x12x32xf32, #tpu.memory_space<vmem>>, vector<1x1x12x32xf32>,
    %c0_52 = arith.constant 0 : index
    %c0_53 = arith.constant 0 : index
    %c0_54 = arith.constant 0 : index
    %58 = vector.load %arg5[%c0_52, %c0_53, %c0_54] : memref<4x12x8xf32, #tpu.memory_space<vmem>>, vector<1x12x8xf32>
    %59 = vector.shape_cast %58 : vector<1x12x8xf32> to vector<12x8xf32>
    %cst_55 = arith.constant dense<0.000000e+00> : vector<12x32xf32>
    %60 = tpu.matmul %59, %32, %cst_55 {dimension_numbers = #tpu.dot_dimension_numbers<[1], [0], [0], [1], [0, 0, 1, 1], [], []>} : vector<12x8xf32>, vector<8x32xf32>, vector<12x32xf32> -> vector<12x32xf32>
    %cst_56 = arith.constant dense<0.000000e+00> : vector<8x32xf32>
    %61 = tpu.matmul %31, %1, %cst_56 {dimension_numbers = #tpu.dot_dimension_numbers<[1], [0], [0], [1], [0, 0, 1, 1], [], []>} : vector<8x32xf32>, vector<32x32xf32>, vector<8x32xf32> -> vector<8x32xf32>
    %c1_57 = arith.constant 1 : index
    %c0_58 = arith.constant 0 : index
    %c0_59 = arith.constant 0 : index
    %62 = vector.load %arg5[%c1_57, %c0_58, %c0_59] : memref<4x12x8xf32, #tpu.memory_space<vmem>>, vector<1x12x8xf32>
    %63 = vector.shape_cast %62 : vector<1x12x8xf32> to vector<12x8xf32>
    %cst_60 = arith.constant dense<0.000000e+00> : vector<12x32xf32>
    %64 = tpu.matmul %63, %61, %cst_60 {dimension_numbers = #tpu.dot_dimension_numbers<[1], [0], [0], [1], [0, 0, 1, 1], [], []>} : vector<12x8xf32>, vector<8x32xf32>, vector<12x32xf32> -> vector<12x32xf32>
    %65 = arith.addf %60, %64 : vector<12x32xf32>
    %c2_61 = arith.constant 2 : index
    %c0_62 = arith.constant 0 : index
    %c0_63 = arith.constant 0 : index
    %66 = vector.load %arg5[%c2_61, %c0_62, %c0_63] : memref<4x12x8xf32, #tpu.memory_space<vmem>>, vector<1x12x8xf32>
    %67 = vector.shape_cast %66 : vector<1x12x8xf32> to vector<12x8xf32>
    %cst_64 = arith.constant dense<0.000000e+00> : vector<12x32xf32>
    %68 = tpu.matmul %67, %34, %cst_64 {dimension_numbers = #tpu.dot_dimension_numbers<[1], [0], [0], [1], [0, 0, 1, 1], [], []>} : vector<12x8xf32>, vector<8x32xf32>, vector<12x32xf32> -> vector<12x32xf32>
    %69 = arith.addf %65, %68 : vector<12x32xf32>
    %cst_65 = arith.constant dense<0.000000e+00> : vector<8x32xf32>
    %70 = tpu.matmul %33, %1, %cst_65 {dimension_numbers = #tpu.dot_dimension_numbers<[1], [0], [0], [1], [0, 0, 1, 1], [], []>} : vector<8x32xf32>, vector<32x32xf32>, vector<8x32xf32> -> vector<8x32xf32>
    %c3_66 = arith.constant 3 : index
    %c0_67 = arith.constant 0 : index
    %c0_68 = arith.constant 0 : index
    %71 = vector.load %arg5[%c3_66, %c0_67, %c0_68] : memref<4x12x8xf32, #tpu.memory_space<vmem>>, vector<1x12x8xf32>
    %72 = vector.shape_cast %71 : vector<1x12x8xf32> to vector<12x8xf32>
    %cst_69 = arith.constant dense<0.000000e+00> : vector<12x32xf32>
    %73 = tpu.matmul %72, %70, %cst_69 {dimension_numbers = #tpu.dot_dimension_numbers<[1], [0], [0], [1], [0, 0, 1, 1], [], []>} : vector<12x8xf32>, vector<8x32xf32>, vector<12x32xf32> -> vector<12x32xf32>
    %74 = arith.addf %69, %73 : vector<12x32xf32>
    %75 = vector.broadcast %35 : vector<12x1xf32> to vector<12x32xf32>
    %76 = arith.addf %74, %75 : vector<12x32xf32>
    %cst_70 = arith.constant 0.000000e+00 : f32
    %77 = vector.broadcast %cst_70 : f32 to vector<12x32xf32>
    %78 = arith.maximumf %76, %77 : vector<12x32xf32>
    %c0_71 = arith.constant 0 : index
    %c1_72 = arith.constant 1 : index
    %c0_73 = arith.constant 0 : index
    %c0_74 = arith.constant 0 : index
    %79 = vector.load %arg7[%c0_71, %c1_72, %c0_73, %c0_74] : memref<1x4x12x32xf32, #tpu.memory_space<vmem>>, vector<1x1x12x32xf32>
    %80 = vector.shape_cast %79 : vector<1x1x12x32xf32> to vector<12x32xf32>
    %81 = vector.shape_cast %78 : vector<12x32xf32> to vector<1x1x12x32xf32>
    tpu.vector_store %arg7[%c0_71, %c1_72, %c0_73, %c0_74], %81 {strides = array<i32>} : memref<1x4x12x32xf32, #tpu.memory_space<vmem>>, vector<1x1x12x32xf32>,
    %c0_75 = arith.constant 0 : index
    %c0_76 = arith.constant 0 : index
    %c0_77 = arith.constant 0 : index
    %82 = vector.load %arg5[%c0_75, %c0_76, %c0_77] : memref<4x12x8xf32, #tpu.memory_space<vmem>>, vector<1x12x8xf32>
    %83 = vector.shape_cast %82 : vector<1x12x8xf32> to vector<12x8xf32>
    %cst_78 = arith.constant dense<0.000000e+00> : vector<12x32xf32>
    %84 = tpu.matmul %83, %33, %cst_78 {dimension_numbers = #tpu.dot_dimension_numbers<[1], [0], [0], [1], [0, 0, 1, 1], [], []>} : vector<12x8xf32>, vector<8x32xf32>, vector<12x32xf32> -> vector<12x32xf32>
    %c1_79 = arith.constant 1 : index
    %c0_80 = arith.constant 0 : index
    %c0_81 = arith.constant 0 : index
    %85 = vector.load %arg5[%c1_79, %c0_80, %c0_81] : memref<4x12x8xf32, #tpu.memory_space<vmem>>, vector<1x12x8xf32>
    %86 = vector.shape_cast %85 : vector<1x12x8xf32> to vector<12x8xf32>
    %cst_82 = arith.constant dense<0.000000e+00> : vector<12x32xf32>
    %87 = tpu.matmul %86, %34, %cst_82 {dimension_numbers = #tpu.dot_dimension_numbers<[1], [0], [0], [1], [0, 0, 1, 1], [], []>} : vector<12x8xf32>, vector<8x32xf32>, vector<12x32xf32> -> vector<12x32xf32>
    %88 = arith.addf %84, %87 : vector<12x32xf32>
    %cst_83 = arith.constant dense<0.000000e+00> : vector<8x32xf32>
    %89 = tpu.matmul %31, %3, %cst_83 {dimension_numbers = #tpu.dot_dimension_numbers<[1], [0], [0], [1], [0, 0, 1, 1], [], []>} : vector<8x32xf32>, vector<32x32xf32>, vector<8x32xf32> -> vector<8x32xf32>
    %c2_84 = arith.constant 2 : index
    %c0_85 = arith.constant 0 : index
    %c0_86 = arith.constant 0 : index
    %90 = vector.load %arg5[%c2_84, %c0_85, %c0_86] : memref<4x12x8xf32, #tpu.memory_space<vmem>>, vector<1x12x8xf32>
    %91 = vector.shape_cast %90 : vector<1x12x8xf32> to vector<12x8xf32>
    %cst_87 = arith.constant dense<0.000000e+00> : vector<12x32xf32>
    %92 = tpu.matmul %91, %89, %cst_87 {dimension_numbers = #tpu.dot_dimension_numbers<[1], [0], [0], [1], [0, 0, 1, 1], [], []>} : vector<12x8xf32>, vector<8x32xf32>, vector<12x32xf32> -> vector<12x32xf32>
    %93 = arith.addf %88, %92 : vector<12x32xf32>
    %cst_88 = arith.constant dense<0.000000e+00> : vector<8x32xf32>
    %94 = tpu.matmul %32, %3, %cst_88 {dimension_numbers = #tpu.dot_dimension_numbers<[1], [0], [0], [1], [0, 0, 1, 1], [], []>} : vector<8x32xf32>, vector<32x32xf32>, vector<8x32xf32> -> vector<8x32xf32>
    %c3_89 = arith.constant 3 : index
    %c0_90 = arith.constant 0 : index
    %c0_91 = arith.constant 0 : index
    %95 = vector.load %arg5[%c3_89, %c0_90, %c0_91] : memref<4x12x8xf32, #tpu.memory_space<vmem>>, vector<1x12x8xf32>
    %96 = vector.shape_cast %95 : vector<1x12x8xf32> to vector<12x8xf32>
    %cst_92 = arith.constant dense<0.000000e+00> : vector<12x32xf32>
    %97 = tpu.matmul %96, %94, %cst_92 {dimension_numbers = #tpu.dot_dimension_numbers<[1], [0], [0], [1], [0, 0, 1, 1], [], []>} : vector<12x8xf32>, vector<8x32xf32>, vector<12x32xf32> -> vector<12x32xf32>
    %98 = arith.addf %93, %97 : vector<12x32xf32>
    %99 = vector.broadcast %35 : vector<12x1xf32> to vector<12x32xf32>
    %100 = arith.addf %98, %99 : vector<12x32xf32>
    %cst_93 = arith.constant 0.000000e+00 : f32
    %101 = vector.broadcast %cst_93 : f32 to vector<12x32xf32>
    %102 = arith.maximumf %100, %101 : vector<12x32xf32>
    %c0_94 = arith.constant 0 : index
    %c2_95 = arith.constant 2 : index
    %c0_96 = arith.constant 0 : index
    %c0_97 = arith.constant 0 : index
    %103 = vector.load %arg7[%c0_94, %c2_95, %c0_96, %c0_97] : memref<1x4x12x32xf32, #tpu.memory_space<vmem>>, vector<1x1x12x32xf32>
    %104 = vector.shape_cast %103 : vector<1x1x12x32xf32> to vector<12x32xf32>
    %105 = vector.shape_cast %102 : vector<12x32xf32> to vector<1x1x12x32xf32>
    tpu.vector_store %arg7[%c0_94, %c2_95, %c0_96, %c0_97], %105 {strides = array<i32>} : memref<1x4x12x32xf32, #tpu.memory_space<vmem>>, vector<1x1x12x32xf32>,
    %c0_98 = arith.constant 0 : index
    %c0_99 = arith.constant 0 : index
    %c0_100 = arith.constant 0 : index
    %106 = vector.load %arg5[%c0_98, %c0_99, %c0_100] : memref<4x12x8xf32, #tpu.memory_space<vmem>>, vector<1x12x8xf32>
    %107 = vector.shape_cast %106 : vector<1x12x8xf32> to vector<12x8xf32>
    %cst_101 = arith.constant dense<0.000000e+00> : vector<12x32xf32>
    %108 = tpu.matmul %107, %34, %cst_101 {dimension_numbers = #tpu.dot_dimension_numbers<[1], [0], [0], [1], [0, 0, 1, 1], [], []>} : vector<12x8xf32>, vector<8x32xf32>, vector<12x32xf32> -> vector<12x32xf32>
    %c1_102 = arith.constant 1 : index
    %c0_103 = arith.constant 0 : index
    %c0_104 = arith.constant 0 : index
    %109 = vector.load %arg5[%c1_102, %c0_103, %c0_104] : memref<4x12x8xf32, #tpu.memory_space<vmem>>, vector<1x12x8xf32>
    %110 = vector.shape_cast %109 : vector<1x12x8xf32> to vector<12x8xf32>
    %cst_105 = arith.constant dense<0.000000e+00> : vector<12x32xf32>
    %111 = tpu.matmul %110, %70, %cst_105 {dimension_numbers = #tpu.dot_dimension_numbers<[1], [0], [0], [1], [0, 0, 1, 1], [], []>} : vector<12x8xf32>, vector<8x32xf32>, vector<12x32xf32> -> vector<12x32xf32>
    %112 = arith.addf %108, %111 : vector<12x32xf32>
    %c2_106 = arith.constant 2 : index
    %c0_107 = arith.constant 0 : index
    %c0_108 = arith.constant 0 : index
    %113 = vector.load %arg5[%c2_106, %c0_107, %c0_108] : memref<4x12x8xf32, #tpu.memory_space<vmem>>, vector<1x12x8xf32>
    %114 = vector.shape_cast %113 : vector<1x12x8xf32> to vector<12x8xf32>
    %cst_109 = arith.constant dense<0.000000e+00> : vector<12x32xf32>
    %115 = tpu.matmul %114, %94, %cst_109 {dimension_numbers = #tpu.dot_dimension_numbers<[1], [0], [0], [1], [0, 0, 1, 1], [], []>} : vector<12x8xf32>, vector<8x32xf32>, vector<12x32xf32> -> vector<12x32xf32>
    %116 = arith.addf %112, %115 : vector<12x32xf32>
    %cst_110 = arith.constant dense<0.000000e+00> : vector<8x32xf32>
    %117 = tpu.matmul %31, %5, %cst_110 {dimension_numbers = #tpu.dot_dimension_numbers<[1], [0], [0], [1], [0, 0, 1, 1], [], []>} : vector<8x32xf32>, vector<32x32xf32>, vector<8x32xf32> -> vector<8x32xf32>
    %c3_111 = arith.constant 3 : index
    %c0_112 = arith.constant 0 : index
    %c0_113 = arith.constant 0 : index
    %118 = vector.load %arg5[%c3_111, %c0_112, %c0_113] : memref<4x12x8xf32, #tpu.memory_space<vmem>>, vector<1x12x8xf32>
    %119 = vector.shape_cast %118 : vector<1x12x8xf32> to vector<12x8xf32>
    %cst_114 = arith.constant dense<0.000000e+00> : vector<12x32xf32>
    %120 = tpu.matmul %119, %117, %cst_114 {dimension_numbers = #tpu.dot_dimension_numbers<[1], [0], [0], [1], [0, 0, 1, 1], [], []>} : vector<12x8xf32>, vector<8x32xf32>, vector<12x32xf32> -> vector<12x32xf32>
    %121 = arith.addf %116, %120 : vector<12x32xf32>
    %122 = vector.broadcast %35 : vector<12x1xf32> to vector<12x32xf32>
    %123 = arith.addf %121, %122 : vector<12x32xf32>
    %cst_115 = arith.constant 0.000000e+00 : f32
    %124 = vector.broadcast %cst_115 : f32 to vector<12x32xf32>
    %125 = arith.maximumf %123, %124 : vector<12x32xf32>
    %c0_116 = arith.constant 0 : index
    %c3_117 = arith.constant 3 : index
    %c0_118 = arith.constant 0 : index
    %c0_119 = arith.constant 0 : index
    %126 = vector.load %arg7[%c0_116, %c3_117, %c0_118, %c0_119] : memref<1x4x12x32xf32, #tpu.memory_space<vmem>>, vector<1x1x12x32xf32>
    %127 = vector.shape_cast %126 : vector<1x1x12x32xf32> to vector<12x32xf32>
    %128 = vector.shape_cast %125 : vector<12x32xf32> to vector<1x1x12x32xf32>
    tpu.vector_store %arg7[%c0_116, %c3_117, %c0_118, %c0_119], %128 {strides = array<i32>} : memref<1x4x12x32xf32, #tpu.memory_space<vmem>>, vector<1x1x12x32xf32>,
    return
  }
  func.func @transform_0(%arg0: i32) -> (i32, i32, i32) {
    %c0_i32 = arith.constant 0 : i32
    %c0_i32_0 = arith.constant 0 : i32
    %c0_i32_1 = arith.constant 0 : i32
    return %arg0, %c0_i32, %c0_i32_0 : i32, i32, i32
  }
  func.func @transform_1(%arg0: i32) -> (i32, i32, i32) {
    %c0_i32 = arith.constant 0 : i32
    %c0_i32_0 = arith.constant 0 : i32
    %c0_i32_1 = arith.constant 0 : i32
    %c0_i32_2 = arith.constant 0 : i32
    return %c0_i32, %c0_i32_0, %c0_i32_1 : i32, i32, i32
  }
  func.func @transform_2(%arg0: i32) -> (i32, i32, i32) {
    %c0_i32 = arith.constant 0 : i32
    %c0_i32_0 = arith.constant 0 : i32
    %c0_i32_1 = arith.constant 0 : i32
    %c0_i32_2 = arith.constant 0 : i32
    return %c0_i32, %c0_i32_0, %c0_i32_1 : i32, i32, i32
  }
  func.func @transform_3(%arg0: i32) -> (i32, i32) {
    %c0_i32 = arith.constant 0 : i32
    %c0_i32_0 = arith.constant 0 : i32
    %c0_i32_1 = arith.constant 0 : i32
    return %c0_i32, %c0_i32_0 : i32, i32
  }
  func.func @transform_4(%arg0: i32) -> (i32, i32, i32) {
    %c0_i32 = arith.constant 0 : i32
    %c0_i32_0 = arith.constant 0 : i32
    %c0_i32_1 = arith.constant 0 : i32
    %c0_i32_2 = arith.constant 0 : i32
    return %c0_i32, %c0_i32_0, %c0_i32_1 : i32, i32, i32
  }
  func.func @transform_5(%arg0: i32) -> (i32, i32) {
    %c0_i32 = arith.constant 0 : i32
    %c0_i32_0 = arith.constant 0 : i32
    %c0_i32_1 = arith.constant 0 : i32
    return %c0_i32, %c0_i32_0 : i32, i32
  }
  func.func @transform_6(%arg0: i32) -> (i32, i32, i32, i32) {
    %c0_i32 = arith.constant 0 : i32
    %c0_i32_0 = arith.constant 0 : i32
    %c0_i32_1 = arith.constant 0 : i32
    %c0_i32_2 = arith.constant 0 : i32
    return %arg0, %c0_i32, %c0_i32_0, %c0_i32_1 : i32, i32, i32, i32
  }
}

</mosaic_0001>

<bundles_post_ra>
// kernel: _decoder_apply.1
= control target key start
LH: loop header
LB: loop body
LE: loop exit
PB: predicated region body
PF: predicated region fallthrough
CT: control target
= control target key end

     0   :  { %vm46_vm0 = vcmask 261120   ;;  %vm75_vm1 = vcmask 64512   ;;  %v1105_v17 = vmov 0   ;;  %vm474_vm2 = vcmask 257024   ;;  %s1504_s1 = inlined_call_operand.vmem [shape: f32[3,32,32], index: 1, kind: input, shape index: {}]   ;;  %s1505_s0 = inlined_call_operand.vmem [shape: f32[1,8,32], index: 0, kind: input, shape index: {}]   ;;  %s1506_s2 = inlined_call_operand.vmem [shape: f32[4,32,8], index: 2, kind: input, shape index: {}]   ;;  %s1507_s3 = inlined_call_operand.vmem [shape: f32[32,1], index: 3, kind: input, shape index: {}]   ;;  %s1508_s4 = inlined_call_operand.vmem [shape: f32[4,12,8], index: 4, kind: input, shape index: {}]   ;;  %s1509_s5 = inlined_call_operand.vmem [shape: f32[12,1], index: 5, kind: input, shape index: {}]   ;;  %s1510_s6 = inlined_call_operand.vmem [shape: f32[1,4,12,32], index: 6, kind: output, shape index: {}]  }
   0x1   :  { %v1144_v0 = vld [vmem:[%s1504_s1 + $0x38] sm:$0xff]  ;;  %v1149_v1 = vld [vmem:[%s1504_s1 + $0x30] sm:$0xff]  ;;  %v37_v2 = vld [vmem:[%s1505_s0] sm:$0xff]  ;;  %1102 = vset.pattern.permute.xlu0 %v1105_v17  ;;  %1103 = vset.pattern.permute.xlu1 %v1105_v17 }
   0x2   :  { %170 = vmatpush.msra.mxu3 %v1144_v0  ;;  %v1158_v3 = vld [vmem:[%s1504_s1 + $0x28] sm:$0xff]  ;;  %144 = vmatpush.msra.mxu2 %v37_v2  ;;  %v1164_v4 = vld [vmem:[%s1504_s1 + $0x18] sm:$0xff]  ;;  %v1169_v5 = vld [vmem:[%s1504_s1 + $0x10] sm:$0xff] }
   0x3   :  { %v1174_v6 = vld [vmem:[%s1504_s1 + $0x20] sm:$0xff]  ;;  %62 = vmatpush.msra.mxu0 %v1164_v4  ;;  %v1181_v7 = vld [vmem:[%s1504_s1 + $0x8] sm:$0xff]  ;;  %v1186_v8 = vld [vmem:[%s1504_s1 + $0x58] sm:$0xff]  ;;  %1104 = vset.pattern.permute.xlu2 %v1105_v17 }
   0x4   :  { %171 = vmatpush.msra.mxu3 %v1149_v1  ;;  %v1193_v9 = vld [vmem:[%s1504_s1] sm:$0xff]  ;;  %v1199_v10 = vld [vmem:[%s1504_s1 + $0x50] sm:$0xff]  ;;  %v1206_v11 = vld [vmem:[%s1504_s1 + $0x48] sm:$0xff] }
   0x5   :  { %63 = vmatpush.msra.mxu0 %v1169_v5  ;;  %v1214_v12 = vld [vmem:[%s1504_s1 + $0x40] sm:$0xff]  ;;  %v43_v14 = vld [vmem:[%s1506_s2 + $0x8] sm:$0xff]  ;;  %v44_v16 = vld [vmem:[%s1506_s2 + $0x10] sm:$0xff] }
   0x6   :  { %172 = vmatpush.msra.mxu3 %v1158_v3  ;;  %v42_v13 = vld [vmem:[%s1506_s2] sm:$0xff]  ;;  %v39_v15 = vld [vmem:[%s1507_s3 + $0x8] sm:$0xff]  ;;  %v45_v19 = vld [vmem:[%s1506_s2 + $0x18] sm:$0xff] }
   0x7   :  { %64 = vmatpush.msra.mxu0 %v1181_v7  ;;  %1011 = vmatmul.msk.f32.vlgmr.msra.gmra.mxu2 %vm75_vm1, %v42_v13  ;;  %v38_v18 = vld [vmem:[%s1507_s3] sm:$0xff]  ;;  %v41_v24 = vld [vmem:[%s1507_s3 + $0x18] sm:$0xff]  ;;  %v1004_v25 = vld [vmem:[%s1506_s2 + $0x28] sm:$0xff] }
   0x8   :  { %173 = vmatpush.msra.mxu3 %v1174_v6  ;;  %305 = vperm.xlu0 %1102, %v39_v15   ;;  %v1003_v20 = vld [vmem:[%s1506_s2 + $0x20] sm:$0xff]  ;;  %v1017_v27 = vld [vmem:[%s1506_s2 + $0x48] sm:$0xff]  ;;  %v40_v29 = vld [vmem:[%s1507_s3 + $0x10] sm:$0xff] }
   0x9   :  { %1015 = vmatmul.msk.f32.vlgmr.msra.gmra.mxu3 %vm46_vm0, %v37_v2  ;;  %65 = vmatpush.msra.mxu0 %v1193_v9  ;;  %v1016_v22 = vld [vmem:[%s1506_s2 + $0x40] sm:$0xff]  ;;  %v1005_v30 = vld [vmem:[%s1506_s2 + $0x30] sm:$0xff]  ;;  %v1026_v31 = vld [vmem:[%s1506_s2 + $0x68] sm:$0xff] }
   0xa   :  { %240 = vmatpush.msrb.mxu3 %v1186_v8  ;;  %1002 = vmatmul.msk.f32.vlgmr.msra.gmra.mxu0 %vm46_vm0, %v37_v2  ;;  %v1025_v26 = vld [vmem:[%s1506_s2 + $0x60] sm:$0xff]  ;;  %v1018_v32 = vld [vmem:[%s1506_s2 + $0x50] sm:$0xff]  ;;  %v1006_v33 = vld [vmem:[%s1506_s2 + $0x38] sm:$0xff] }
   0xb   :  { %315 = vperm.xlu1 %1103, %v41_v24   ;;  %v1027_v34 = vld [vmem:[%s1506_s2 + $0x70] sm:$0xff]  ;;  %v1019_v35 = vld [vmem:[%s1506_s2 + $0x58] sm:$0xff]  ;;  %v1300_v55 = vld [vmem:[%s1508_s4] sm:$0xff] }
   0xc   :  { %241 = vmatpush.msrb.mxu3 %v1199_v10  ;;  %v1028_v36 = vld [vmem:[%s1506_s2 + $0x78] sm:$0xff]  ;;  %v329_v56 = vld [vmem:[%s1508_s4 + $0x8] sm:$0xf]  ;;  %v1318_v13 = vld [vmem:[%s1508_s4 + $0x10] sm:$0xff] }
   0xd   :  { %v1034_v24 = vld [vmem:[%s1508_s4 + $0x18] sm:$0xf] }
   0xe   :  { %242 = vmatpush.msrb.mxu3 %v1206_v11 }
   0xf   :  { %1012 = vmatmul.msk.f32.gmra.mxu2 %vm75_vm1, %v43_v14 }
  0x10   :  { %243 = vmatpush.msrb.mxu3 %v1214_v12  ;;  %300 = vperm.xlu0 %1102, %v38_v18  }
  0x11   :  { %1024 = vmatmul.msk.f32.vlgmr.msrb.gmra.mxu3 %vm46_vm0, %v37_v2 }
  0x13   :  { %310 = vperm.xlu1 %1103, %v40_v29  }
  0x17   :  { %1013 = vmatmul.msk.f32.gmra.mxu2 %vm75_vm1, %v44_v16 }
  0x1f   :  { %1014 = vmatmul.msk.f32.gmra.mxu2 %vm75_vm1, %v45_v19 }
  0x7a   :  { %v306_v40 = vpop.permute.xlu0 %305 }
  0x7d   :  { %v316_v57 = vpop.permute.xlu1 %315 }
  0x82   :  { %v301_v47 = vpop.permute.xlu0 %300 }
  0x85   :  { %v311_v17 = vpop.permute.xlu1 %310 }
  0x87   :  { %v67_v21 = vpop.f32.mrf.mxu0 }
  0x88   :  { %103 = vmatpush.msra.mxu1 %v67_v21 }
  0x89   :  { %1007 = vmatmul.msk.f32.vlgmr.msra.gmra.mxu1 %vm75_vm1, %v1003_v20 }
  0x8a   :  { %v146_v38 = vpop.f32.mrf.mxu2 }
  0x8c   :  { %v175_v23 = vpop.f32.mrf.mxu3 }
  0x8d   :  { %210 = vmatpush.msrb.mxu0 %v175_v23 }
  0x8e   :  { %1020 = vmatmul.msk.f32.vlgmr.msrb.gmra.mxu0 %vm75_vm1, %v1016_v22 }
  0x91   :  { %1008 = vmatmul.msk.f32.gmra.mxu1 %vm75_vm1, %v1004_v25  ;;  %v1333_v25 = vld [vmem:[%s1508_s4 + $0x20] sm:$0xff] }
  0x92   :  { %v149_v43 = vpop.f32.mrf.mxu2 }
  0x94   :  { %v245_v28 = vpop.f32.mrf.mxu3 }
  0x95   :  { %280 = vmatpush.msra.mxu3 %v245_v28 }
  0x96   :  { %1029 = vmatmul.msk.f32.vlgmr.msra.gmra.mxu3 %vm75_vm1, %v1025_v26  ;;  %1021 = vmatmul.msk.f32.gmra.mxu0 %vm75_vm1, %v1017_v27  ;;  %v326_v27 = vld [vmem:[%s1509_s5] sm:$0xff] }
  0x97   :  { %461 = vperm.xlu2 %1104, %v326_v27  }
  0x99   :  { %1009 = vmatmul.msk.f32.gmra.mxu1 %vm75_vm1, %v1005_v30 }
  0x9a   :  { %v152_v52 = vpop.f32.mrf.mxu2 }
  0x9e   :  { %1030 = vmatmul.msk.f32.gmra.mxu3 %vm75_vm1, %v1026_v31  ;;  %1022 = vmatmul.msk.f32.gmra.mxu0 %vm75_vm1, %v1018_v32  ;;  %v1040_v31 = vld [vmem:[%s1508_s4 + $0x28] sm:$0xf]  ;;  %v1351_v32 = vld [vmem:[%s1508_s4 + $0x30] sm:$0xff] }
  0xa1   :  { %1010 = vmatmul.msk.f32.gmra.mxu1 %vm75_vm1, %v1006_v33  ;;  %v327_v33 = vld [vmem:[%s1509_s5 + $0x8] sm:$0xf] }
  0xa2   :  { %v155_v15 = vpop.f32.mrf.mxu2  ;;  %466 = vperm.xlu2 %1104, %v327_v33  }
  0xa6   :  { %1031 = vmatmul.msk.f32.gmra.mxu3 %vm75_vm1, %v1027_v34  ;;  %1023 = vmatmul.msk.f32.gmra.mxu0 %vm75_vm1, %v1019_v35  ;;  %v1044_v34 = vld [vmem:[%s1508_s4 + $0x38] sm:$0xf] }
  0xae   :  { %1032 = vmatmul.msk.f32.gmra.mxu3 %vm75_vm1, %v1028_v36 }
 0x106   :  { %v105_v37 = vpop.f32.mrf.mxu1 }
 0x107   :  { %v147_v41 = vadd.f32 %v146_v38, %v105_v37 }
 0x10b   :  { %v212_v39 = vpop.f32.mrf.mxu0 }
 0x10c   :  { %v224_v44 = vadd.f32 %v212_v39, %v147_v41  ;;  %v1393_v39 = vpop.permute.xlu2 %461 }
 0x10e   :  { %v108_v42 = vpop.f32.mrf.mxu1 }
 0x10f   :  { %v150_v49 = vadd.f32 %v149_v43, %v108_v42 }
 0x113   :  { %v215_v45 = vpop.f32.mrf.mxu0 }
 0x114   :  { %v225_v54 = vadd.f32 %v215_v45, %v150_v49 }
 0x116   :  { %v111_v51 = vpop.f32.mrf.mxu1 }
 0x117   :  { %v153_v61 = vadd.f32 %v152_v52, %v111_v51 }
 0x119   :  { %v282_v46 = vpop.f32.mrf.mxu3 }
 0x11a   :  { %v294_v48 = vadd.f32 %v282_v46, %v224_v44 }
 0x11b   :  { %v218_v59 = vpop.f32.mrf.mxu0 }
 0x11c   :  { %v318_v50 = vadd.f32 %v301_v47, %v294_v48  ;;  %v226_v2 = vadd.f32 %v218_v59, %v153_v61  ;;  %v1060_v61 = vld [vmem:[%s1508_s4 + $0x38] sm:$0xf] }
 0x11e   :  { %v1295_v53 = vmax.f32 %v318_v50, 0.0  ;;  %v114_v14 = vpop.f32.mrf.mxu1  ;;  %v1404_v50 = vpop.permute.xlu2 %466 }
 0x11f   :  { %v156_v19 = vadd.f32 %v155_v15, %v114_v14 }
 0x120   :  { %383 = vmatpush.msrb.mxu2 %v1295_v53  ;;  %1100 = vmatpush.msrb.mxu3 %v1295_v53 }
 0x121   :  { %v285_v58 = vpop.f32.mrf.mxu3  ;;  %1037 = vmatmul.msk.f32.vlgmr.msrb.gmra.mxu2 %vm75_vm1, %v1300_v55  ;;  %1038 = vmatmul.msk.f32.vlgmr.msrb.gmra.mxu3 %vm75_vm1, %v329_v56 }
 0x122   :  { %v295_v60 = vadd.f32 %v285_v58, %v225_v54  ;;  %493 = vmatpush.msra.mxu2 %v1164_v4 }
 0x123   :  { %v221_v20 = vpop.f32.mrf.mxu0 }
 0x124   :  { %v319_v62 = vadd.f32 %v306_v40, %v295_v60  ;;  %494 = vmatpush.msra.mxu2 %v1169_v5  ;;  %v227_v23 = vadd.f32 %v221_v20, %v156_v19  ;;  %v1049_v40 = vld [vmem:[%s1508_s4 + $0x18] sm:$0xf] }
 0x126   :  { %v1312_v63 = vmax.f32 %v319_v62, 0.0  ;;  %495 = vmatpush.msra.mxu2 %v1181_v7 }
 0x128   :  { %496 = vmatpush.msra.mxu2 %v1193_v9  ;;  %354 = vmatpush.msrb.mxu1 %v1312_v63 }
 0x129   :  { %v288_v16 = vpop.f32.mrf.mxu3  ;;  %1035 = vmatmul.msk.f32.vlgmr.msrb.gmra.mxu1 %vm75_vm1, %v1318_v13  ;;  %1047 = vmatmul.msk.f32.vlgmr.msra.gmra.mxu2 %vm46_vm0, %v1295_v53 }
 0x12a   :  { %553 = vmatpush.msrb.mxu2 %v1312_v63  ;;  %v296_v18 = vadd.f32 %v288_v16, %v226_v2 }
 0x12c   :  { %v320_v21 = vadd.f32 %v311_v17, %v296_v18 }
 0x12e   :  { %v324_v22 = vmax.f32 %v320_v21, 0.0 }
 0x130   :  { %415 = vmatpush.msra.mxu0 %v324_v22  ;;  %711 = vmatpush.msra.mxu2 %v324_v22 }
 0x131   :  { %v291_v26 = vpop.f32.mrf.mxu3  ;;  %1036 = vmatmul.msk.f32.gmra.mxu1 %vm75_vm1, %v1034_v24  ;;  %1041 = vmatmul.msk.f32.vlgmr.msra.gmra.mxu0 %vm75_vm1, %v1333_v25 }
 0x132   :  { %v297_v28 = vadd.f32 %v291_v26, %v227_v23  ;;  %1052 = vmatmul.msk.f32.vlgmr.msrb.gmra.mxu2 %vm75_vm1, %v1300_v55  ;;  %v1078_v26 = vld [vmem:[%s1508_s4 + $0x38] sm:$0xf] }
 0x134   :  { %v321_v29 = vadd.f32 %v316_v57, %v297_v28 }
 0x136   :  { %v1343_v30 = vmax.f32 %v321_v29, 0.0 }
 0x138   :  { %449 = vmatpush.msra.mxu1 %v1343_v30  ;;  %584 = vmatpush.msrb.mxu0 %v1343_v30 }
 0x139   :  { %1042 = vmatmul.msk.f32.gmra.mxu0 %vm75_vm1, %v1040_v31  ;;  %1045 = vmatmul.msk.f32.vlgmr.msra.gmra.mxu1 %vm75_vm1, %v1351_v32 }
 0x13a   :  { %609 = vmatpush.msrb.mxu1 %v1164_v4  ;;  %731 = vmatpush.msra.mxu0 %v1144_v0  ;;  %v1055_v4 = vld [vmem:[%s1508_s4 + $0x28] sm:$0xf] }
 0x13c   :  { %610 = vmatpush.msrb.mxu1 %v1169_v5  ;;  %732 = vmatpush.msra.mxu0 %v1149_v1  ;;  %v477_v5 = vld [vmem:[%s1508_s4 + $0x8] sm:$0xf] }
 0x13d   :  { %1053 = vmatmul.msk.f32.gmra.mxu2 %vm75_vm1, %v477_v5 }
 0x13e   :  { %611 = vmatpush.msrb.mxu1 %v1181_v7  ;;  %733 = vmatpush.msra.mxu0 %v1158_v3 }
 0x140   :  { %612 = vmatpush.msrb.mxu1 %v1193_v9  ;;  %734 = vmatpush.msra.mxu0 %v1174_v6 }
 0x141   :  { %1046 = vmatmul.msk.f32.gmra.mxu1 %vm75_vm1, %v1044_v34  ;;  %1056 = vmatmul.msk.f32.vlgmr.msrb.gmra.mxu0 %vm75_vm1, %v1333_v25 }
 0x142   :  { %682 = vmatpush.msra.mxu1 %v1343_v30 }
 0x145   :  { %1069 = vmatmul.msk.f32.vlgmr.msra.gmra.mxu2 %vm75_vm1, %v1300_v55 }
 0x149   :  { %1057 = vmatmul.msk.f32.gmra.mxu0 %vm75_vm1, %v1055_v4  ;;  %1058 = vmatmul.msk.f32.vlgmr.msrb.gmra.mxu1 %vm46_vm0, %v324_v22 }
 0x151   :  { %1071 = vmatmul.msk.f32.vlgmr.msra.gmra.mxu0 %vm46_vm0, %v1295_v53  ;;  %1067 = vmatmul.msk.f32.vlgmr.msra.gmra.mxu1 %vm75_vm1, %v1318_v13 }
 0x1a4   :  { %v385_v7 = vpop.f32.mrf.mxu2  ;;  %v388_v45 = vpop.f32.mrf.mxu3 }
 0x1a6   :  { %v356_v9 = vpop.f32.mrf.mxu1 }
 0x1a7   :  { %v386_v38 = vadd.f32 %v385_v7, %v356_v9 }
 0x1ac   :  { %v498_v35 = vpop.f32.mrf.mxu2 }
 0x1ad   :  { %524 = vmatpush.msra.mxu3 %v498_v35 }
 0x1ae   :  { %v359_v36 = vpop.f32.mrf.mxu1  ;;  %v417_v37 = vpop.f32.mrf.mxu0  ;;  %1050 = vmatmul.msk.f32.vlgmr.msra.gmra.mxu3 %vm75_vm1, %v1318_v13 }
 0x1af   :  { %v423_v41 = vadd.f32 %v417_v37, %v386_v38  ;;  %v389_v48 = vadd.f32 %v388_v45, %v359_v36 }
 0x1b5   :  { %v555_v62 = vpop.f32.mrf.mxu2 }
 0x1b6   :  { %v420_v42 = vpop.f32.mrf.mxu0  ;;  %v451_v43 = vpop.f32.mrf.mxu1  ;;  %1051 = vmatmul.msk.f32.gmra.mxu3 %vm75_vm1, %v1049_v40 }
 0x1b7   :  { %v457_v44 = vadd.f32 %v451_v43, %v423_v41  ;;  %v424_v49 = vadd.f32 %v420_v42, %v389_v48  ;;  %v1095_v41 = vld [vmem:[%s1508_s4 + $0x38] sm:$0xf] }
 0x1b9   :  { %v469_v46 = vadd.f32 %v1393_v39, %v457_v44 }
 0x1bb   :  { %v471_v47 = vmax.f32 %v469_v46, 0.0 }
 0x1bd   :  { %473 = vst.msk [vmem:[%s1510_s6] sm:$0xff] %vm46_vm0, %v471_v47 }
 0x1be   :  { %v454_v51 = vpop.f32.mrf.mxu1  ;;  %v586_v52 = vpop.f32.mrf.mxu0 }
 0x1bf   :  { %v458_v54 = vadd.f32 %v454_v51, %v424_v49 }
 0x1c0   :  { %v558_v16 = vpop.f32.mrf.mxu2 }
 0x1c1   :  { %v470_v56 = vadd.f32 %v1404_v50, %v458_v54 }
 0x1c3   :  { %v472_v57 = vmax.f32 %v470_v56, 0.0 }
 0x1c5   :  { %475 = vst.msk [vmem:[%s1510_s6 + $0x8] sm:$0xf] %vm474_vm2, %v472_v57 }
 0x1c6   :  { %v589_v58 = vpop.f32.mrf.mxu0  ;;  %v614_v59 = vpop.f32.mrf.mxu1 }
 0x1c7   :  { %640 = vmatpush.msrb.mxu3 %v614_v59  ;;  %860 = vmatpush.msrb.mxu2 %v614_v59 }
 0x1c8   :  { %1061 = vmatmul.msk.f32.vlgmr.msrb.gmra.mxu3 %vm75_vm1, %v1351_v32 }
 0x1c9   :  { %787 = vmatpush.msra.mxu3 %v1144_v0  ;;  %v658_v0 = vld [vmem:[%s1508_s4 + $0x8] sm:$0xf] }
 0x1ca   :  { %1070 = vmatmul.msk.f32.gmra.mxu2 %vm75_vm1, %v658_v0 }
 0x1cb   :  { %788 = vmatpush.msra.mxu3 %v1149_v1  ;;  %v1066_v1 = vld [vmem:[%s1508_s4 + $0x18] sm:$0xf] }
 0x1cc   :  { %1068 = vmatmul.msk.f32.gmra.mxu1 %vm75_vm1, %v1066_v1 }
 0x1cd   :  { %789 = vmatpush.msra.mxu3 %v1158_v3 }
 0x1ce   :  { %v736_v60 = vpop.f32.mrf.mxu0 }
 0x1cf   :  { %790 = vmatpush.msra.mxu3 %v1174_v6  ;;  %762 = vmatpush.msrb.mxu0 %v736_v60  ;;  %v1073_v6 = vld [vmem:[%s1508_s4 + $0x28] sm:$0xf] }
 0x1d0   :  { %1074 = vmatmul.msk.f32.vlgmr.msrb.gmra.mxu0 %vm75_vm1, %v1333_v25  ;;  %1062 = vmatmul.msk.f32.gmra.mxu3 %vm75_vm1, %v1060_v61 }
 0x1d1   :  { %889 = vmatpush.msrb.mxu3 %v1343_v30 }
 0x1d2   :  { %1085 = vmatmul.msk.f32.vlgmr.msrb.gmra.mxu2 %vm75_vm1, %v1318_v13 }
 0x1d8   :  { %1076 = vmatmul.msk.f32.vlgmr.msra.gmra.mxu3 %vm46_vm0, %v1312_v63  ;;  %1075 = vmatmul.msk.f32.gmra.mxu0 %vm75_vm1, %v1073_v6 }
 0x1e0   :  { %1087 = vmatmul.msk.f32.vlgmr.msrb.gmra.mxu3 %vm75_vm1, %v1300_v55 }
 0x231   :  { %v526_v3 = vpop.f32.mrf.mxu3 }
 0x232   :  { %v556_v63 = vadd.f32 %v555_v62, %v526_v3 }
 0x234   :  { %v592_v2 = vadd.f32 %v586_v52, %v556_v63 }
 0x239   :  { %v529_v55 = vpop.f32.mrf.mxu3 }
 0x23a   :  { %v559_v18 = vadd.f32 %v558_v16, %v529_v55 }
 0x23c   :  { %v593_v20 = vadd.f32 %v589_v58, %v559_v18 }
 0x24b   :  { %v642_v14 = vpop.f32.mrf.mxu3 }
 0x24c   :  { %v648_v15 = vadd.f32 %v642_v14, %v592_v2 }
 0x24d   :  { %v764_v27 = vpop.f32.mrf.mxu0 }
 0x24e   :  { %v650_v17 = vadd.f32 %v648_v15, %v1393_v39 }
 0x250   :  { %v652_v19 = vmax.f32 %v650_v17, 0.0 }
 0x252   :  { %1063 = vst.msk [vmem:[%s1510_s6 + $0x10] sm:$0xff] %vm46_vm0, %v652_v19 }
 0x253   :  { %v645_v21 = vpop.f32.mrf.mxu3 }
 0x254   :  { %v649_v22 = vadd.f32 %v645_v21, %v593_v20 }
 0x255   :  { %v767_v5 = vpop.f32.mrf.mxu0 }
 0x256   :  { %v651_v13 = vadd.f32 %v649_v22, %v1404_v50 }
 0x258   :  { %v653_v23 = vmax.f32 %v651_v13, 0.0 }
 0x25a   :  { %1064 = vst.msk [vmem:[%s1510_s6 + $0x18] sm:$0xf] %vm474_vm2, %v653_v23 }
 0x25b   :  { %v792_v24 = vpop.f32.mrf.mxu3 }
 0x25c   :  { %818 = vmatpush.msrb.mxu1 %v792_v24  ;;  %920 = vmatpush.msra.mxu0 %v792_v24 }
 0x25d   :  { %1079 = vmatmul.msk.f32.vlgmr.msrb.gmra.mxu1 %vm75_vm1, %v1351_v32  ;;  %1091 = vmatmul.msk.f32.vlgmr.msra.gmra.mxu0 %vm75_vm1, %v1333_v25  ;;  %v1084_v25 = vld [vmem:[%s1508_s4 + $0x18] sm:$0xf] }
 0x25e   :  { %942 = vmatpush.msra.mxu1 %v1186_v8  ;;  %v836_v8 = vld [vmem:[%s1508_s4 + $0x8] sm:$0xf]  ;;  %1086 = vmatmul.msk.f32.gmra.mxu2 %vm75_vm1, %v1084_v25 }
 0x25f   :  { %1088 = vmatmul.msk.f32.gmra.mxu3 %vm75_vm1, %v836_v8 }
 0x260   :  { %943 = vmatpush.msra.mxu1 %v1199_v10  ;;  %v684_v10 = vpop.f32.mrf.mxu1 }
 0x262   :  { %944 = vmatpush.msra.mxu1 %v1206_v11  ;;  %v1090_v11 = vld [vmem:[%s1508_s4 + $0x28] sm:$0xf] }
 0x263   :  { %v891_v44 = vpop.f32.mrf.mxu3 }
 0x264   :  { %945 = vmatpush.msra.mxu1 %v1214_v12 }
 0x265   :  { %1080 = vmatmul.msk.f32.gmra.mxu1 %vm75_vm1, %v1078_v26  ;;  %1092 = vmatmul.msk.f32.gmra.mxu0 %vm75_vm1, %v1090_v11 }
 0x268   :  { %v687_v12 = vpop.f32.mrf.mxu1 }
 0x26d   :  { %1093 = vmatmul.msk.f32.vlgmr.msra.gmra.mxu1 %vm46_vm0, %v1295_v53  ;;  %v713_v53 = vpop.f32.mrf.mxu2 }
 0x26e   :  { %v714_v28 = vadd.f32 %v713_v53, %v684_v10 }
 0x270   :  { %v770_v29 = vadd.f32 %v764_v27, %v714_v28 }
 0x275   :  { %v716_v31 = vpop.f32.mrf.mxu2 }
 0x276   :  { %v717_v4 = vadd.f32 %v716_v31, %v687_v12 }
 0x278   :  { %v771_v9 = vadd.f32 %v767_v5, %v717_v4 }
 0x27d   :  { %v862_v42 = vpop.f32.mrf.mxu2 }
 0x27e   :  { %v892_v46 = vadd.f32 %v891_v44, %v862_v42 }
 0x2da   :  { %v820_v30 = vpop.f32.mrf.mxu1  ;;  %v922_v45 = vpop.f32.mrf.mxu0 }
 0x2db   :  { %v826_v33 = vadd.f32 %v820_v30, %v770_v29  ;;  %v928_v47 = vadd.f32 %v922_v45, %v892_v46 }
 0x2dd   :  { %v828_v34 = vadd.f32 %v826_v33, %v1393_v39 }
 0x2df   :  { %v830_v7 = vmax.f32 %v828_v34, 0.0 }
 0x2e1   :  { %1081 = vst.msk [vmem:[%s1510_s6 + $0x20] sm:$0xff] %vm46_vm0, %v830_v7  ;;  %v865_v43 = vpop.f32.mrf.mxu2 }
 0x2e2   :  { %v823_v35 = vpop.f32.mrf.mxu1  ;;  %v894_v49 = vpop.f32.mrf.mxu3 }
 0x2e3   :  { %v827_v36 = vadd.f32 %v823_v35, %v771_v9  ;;  %v895_v54 = vadd.f32 %v894_v49, %v865_v43  ;;  %v925_v56 = vpop.f32.mrf.mxu0 }
 0x2e5   :  { %v829_v37 = vadd.f32 %v827_v36, %v1404_v50  ;;  %v929_v57 = vadd.f32 %v925_v56, %v895_v54 }
 0x2e7   :  { %v831_v38 = vmax.f32 %v829_v37, 0.0 }
 0x2e9   :  { %1082 = vst.msk [vmem:[%s1510_s6 + $0x28] sm:$0xf] %vm474_vm2, %v831_v38 }
 0x2ea   :  { %v947_v40 = vpop.f32.mrf.mxu1 }
 0x2eb   :  { %973 = vmatpush.msra.mxu2 %v947_v40 }
 0x2ec   :  { %1096 = vmatmul.msk.f32.vlgmr.msra.gmra.mxu2 %vm75_vm1, %v1351_v32 }
 0x2f4   :  { %1097 = vmatmul.msk.f32.gmra.mxu2 %vm75_vm1, %v1095_v41 }
 0x36f   :  { %v975_v48 = vpop.f32.mrf.mxu2 }
 0x370   :  { %v981_v51 = vadd.f32 %v975_v48, %v928_v47 }
 0x372   :  { %v983_v52 = vadd.f32 %v981_v51, %v1393_v39 }
 0x374   :  { %v985_v32 = vmax.f32 %v983_v52, 0.0 }
 0x376   :  { %1098 = vst.msk [vmem:[%s1510_s6 + $0x30] sm:$0xff] %vm46_vm0, %v985_v32 }
 0x377   :  { %v978_v58 = vpop.f32.mrf.mxu2 }
 0x378   :  { %v982_v59 = vadd.f32 %v978_v58, %v929_v57 }
 0x37a   :  { %v984_v60 = vadd.f32 %v982_v59, %v1404_v50 }
 0x37c   :  { %v986_v61 = vmax.f32 %v984_v60, 0.0 }
 0x37e   :  { %1099 = vst.msk [vmem:[%s1510_s6 + $0x38] sm:$0xf] %vm474_vm2, %v986_v61 }

</bundles_post_ra>
